<compile_context>
chip_gen: v7x
topology: tpu7x:2x2x1
jax: 0.10.0
libtpu: 0.0.40
codegen_flags: <defaults>
</compile_context>

<pallas_src>
import functools

import jax
import jax.numpy as jnp
from jax import lax
from jax.experimental import pallas as pl
from jax.experimental.pallas import tpu as pltpu


# ----------------------------------------------------------------------------
# Kernels
# ----------------------------------------------------------------------------
def _gram_kernel(feat_ref, gram_ref, acc_ref, *, inv_divisor):
    """Accumulate F @ F^T over K tiles; emit the normalized gram on the last step."""
    k = pl.program_id(0)

    @pl.when(k == 0)
    def _():
        acc_ref[...] = jnp.zeros_like(acc_ref)

    f = feat_ref[...].astype(jnp.float32)
    # Contract the last dim of both operands -> (M, M); no transposed copy.
    acc_ref[...] += lax.dot_general(
        f, f,
        dimension_numbers=(((1,), (1,)), ((), ())),
        preferred_element_type=jnp.float32,
    )

    @pl.when(k == pl.num_programs(0) - 1)
    def _():
        gram_ref[...] = acc_ref[...] * inv_divisor


def _style_loss_kernel(feat_ref, tgt_ref, loss_ref, acc_ref, *, inv_divisor):
    """Accumulate the gram over K tiles, then MSE vs target gram (scalar only)."""
    k = pl.program_id(0)

    @pl.when(k == 0)
    def _():
        acc_ref[...] = jnp.zeros_like(acc_ref)

    f = feat_ref[...].astype(jnp.float32)
    acc_ref[...] += lax.dot_general(
        f, f,
        dimension_numbers=(((1,), (1,)), ((), ())),
        preferred_element_type=jnp.float32,
    )

    @pl.when(k == pl.num_programs(0) - 1)
    def _():
        g = acc_ref[...] * inv_divisor                 # normalize once, at finalize
        diff = g - tgt_ref[...].astype(jnp.float32)
        n_elems = diff.shape[0] * diff.shape[1]
        loss_ref[0, 0] = jnp.sum(diff * diff) * (1.0 / n_elems)


# ----------------------------------------------------------------------------
# Tiling helper
# ----------------------------------------------------------------------------
def _choose_tk(m, k, tk=None):
    """Pick a K-tile: multiple of 128 dividing K, bounded by a VMEM budget."""
    if tk is not None:
        assert k % tk == 0, "explicit tk must divide K"
        return tk
    if k % 128 != 0:
        return k  # irregular K: fall back to a single (untiled) block.
    # Keep the double-buffered (M, tk) f32 feature tile under ~8 MiB.
    budget_elems = (8 * 1024 * 1024) // (2 * 4 * max(m, 1))
    cand = min(k, 2048, max(128, (budget_elems // 128) * 128))
    while k % cand != 0:
        cand -= 128
    return max(cand, 128)


# ----------------------------------------------------------------------------
# Wrappers
# ----------------------------------------------------------------------------
def gram_matrix(x, *, tk=None):
    """x: (B, C, H, W) float32 -> gram: (B*C, B*C) float32 (normalized)."""
    b, c, h, w = x.shape
    m, k = b * c, h * w
    feat = x.reshape(m, k)
    inv_divisor = 1.0 / float(b * c * h * w)
    tk = _choose_tk(m, k, tk)

    return pl.pallas_call(
        functools.partial(_gram_kernel, inv_divisor=inv_divisor),
        out_shape=jax.ShapeDtypeStruct((m, m), jnp.float32),
        grid_spec=pltpu.PrefetchScalarGridSpec(
            num_scalar_prefetch=0,
            grid=(k // tk,),
            in_specs=[pl.BlockSpec((m, tk), lambda kk: (0, kk))],
            out_specs=pl.BlockSpec((m, m), lambda kk: (0, 0)),
            scratch_shapes=[pltpu.VMEM((m, m), jnp.float32)],
        ),
        compiler_params=pltpu.CompilerParams(
            dimension_semantics=("arbitrary",)),
        cost_estimate=pl.CostEstimate(
            flops=2 * m * m * k,
            transcendentals=0,
            bytes_accessed=4 * (m * k + m * m)),
    )(feat)


def style_loss_forward(current_feature, target_gram, *, tk=None):
    """Mirrors StyleLoss.forward: returns (current_feature, scalar loss).

    current_feature: (B, C, H, W) float32
    target_gram:     (B*C, B*C)   float32 (precomputed in "__init__")
    """
    b, c, h, w = current_feature.shape
    m, k = b * c, h * w
    feat = current_feature.reshape(m, k)
    inv_divisor = 1.0 / float(b * c * h * w)
    tk = _choose_tk(m, k, tk)

    loss = pl.pallas_call(
        functools.partial(_style_loss_kernel, inv_divisor=inv_divisor),
        out_shape=jax.ShapeDtypeStruct((1, 1), jnp.float32),
        grid_spec=pltpu.PrefetchScalarGridSpec(
            num_scalar_prefetch=0,
            grid=(k // tk,),
            in_specs=[
                pl.BlockSpec((m, tk), lambda kk: (0, kk)),   # feature K-tiles
                pl.BlockSpec((m, m), lambda kk: (0, 0)),     # target gram (resident)
            ],
            # Scalar loss goes out via SMEM (no 1-lane masked VMEM store).
            out_specs=pl.BlockSpec(memory_space=pltpu.MemorySpace.SMEM),
            scratch_shapes=[pltpu.VMEM((m, m), jnp.float32)],
        ),
        compiler_params=pltpu.CompilerParams(
            dimension_semantics=("arbitrary",)),
        cost_estimate=pl.CostEstimate(
            flops=2 * m * m * k,
            transcendentals=0,
            bytes_accessed=4 * (m * k + m * m + 1)),
    )(feat, target_gram)
    # forward() returns its input unchanged; the loss is the side product.
    return current_feature, loss[0, 0]


class StyleLossJax:
    """JAX/Pallas analogue of the PyTorch StyleLoss module."""

    def __init__(self, target_feature):
        # .detach() analogue: a concrete array, no grad tracking needed.
        self.target_gram = gram_matrix(target_feature)
        self.loss = jnp.float32(0.0)

    def __call__(self, current_feature):
        out, self.loss = style_loss_forward(current_feature, self.target_gram)
        return out


# ----------------------------------------------------------------------------
# Main
# ----------------------------------------------------------------------------
if __name__ == "__main__":
    key = jax.random.PRNGKey(0)
    k_tgt, k_cur = jax.random.split(key)

    B, C, H, W = 2, 4, 16, 16  # (M, K) = (8, 256)
    target_feature = jax.random.normal(k_tgt, (B, C, H, W), dtype=jnp.float32)
    current_feature = jax.random.normal(k_cur, (B, C, H, W), dtype=jnp.float32)

    module = StyleLossJax(target_feature)
    out = module(current_feature)
    out = jax.block_until_ready(out)
    loss = jax.block_until_ready(module.loss)

    # Pure-JAX reference check.
    def ref_gram(x):
        b, c, h, w = x.shape
        f = x.reshape(b * c, h * w)
        return (f @ f.T) / (b * c * h * w)

    ref_loss = jnp.mean((ref_gram(current_feature) - ref_gram(target_feature)) ** 2)
    assert jnp.allclose(out, current_feature), "forward must be a pass-through"
    assert jnp.allclose(loss, ref_loss, rtol=1e-5, atol=1e-6), (loss, ref_loss)

    # Also exercise the multi-step K-reduction path (grid > 1) explicitly.
    tgt_gram_tiled = gram_matrix(target_feature, tk=128)
    _, loss_tiled = style_loss_forward(current_feature, tgt_gram_tiled, tk=128)
    loss_tiled = jax.block_until_ready(loss_tiled)
    assert jnp.allclose(loss_tiled, ref_loss, rtol=1e-5, atol=1e-6), (loss_tiled, ref_loss)

    print("KERNEL_OK")
</pallas_src>

<mosaic_0001>
module attributes {stable_mosaic.version = 11 : i64} {
  func.func @_gram_kernel(%arg0: i32, %arg1: memref<8x256xf32, #tpu.memory_space<vmem>>, %arg2: memref<8x8xf32, #tpu.memory_space<vmem>>, %arg3: memref<8x8xf32, #tpu.memory_space<vmem>>) attributes {dimension_semantics = [#tpu.dimension_semantics<arbitrary>], iteration_bounds = array<i64: 1>, scalar_prefetch = 0 : i64, scratch_operands = 1 : i64, tpu.core_type = #tpu.core_type<tc>, window_params = [{transform_indices = @transform_0, window_bounds = array<i64: 8, 256>}, {pipeline_mode = #tpu.pipeline_mode<synchronous>, transform_indices = @transform_1, window_bounds = array<i64: 8, 8>}]} {
    %c0_i32 = arith.constant 0 : i32
    %0 = arith.cmpi eq, %arg0, %c0_i32 : i32
    %1 = arith.extui %0 : i1 to i32
    %c0_i32_0 = arith.constant 0 : i32
    %2 = arith.cmpi ne, %1, %c0_i32_0 : i32
    scf.if %2 {
      %cst_8 = arith.constant 0.000000e+00 : f32
      %11 = vector.broadcast %cst_8 : f32 to vector<8x8xf32>
      %c0_9 = arith.constant 0 : index
      %c0_10 = arith.constant 0 : index
      %12 = vector.load %arg3[%c0_9, %c0_10] : memref<8x8xf32, #tpu.memory_space<vmem>>, vector<8x8xf32>
      tpu.vector_store %arg3[%c0_9, %c0_10], %11 {strides = array<i32>} : memref<8x8xf32, #tpu.memory_space<vmem>>, vector<8x8xf32>,
    } else {
    }
    %c0 = arith.constant 0 : index
    %c0_1 = arith.constant 0 : index
    %3 = vector.load %arg1[%c0, %c0_1] : memref<8x256xf32, #tpu.memory_space<vmem>>, vector<8x256xf32>
    %c0_2 = arith.constant 0 : index
    %c0_3 = arith.constant 0 : index
    %4 = vector.load %arg3[%c0_2, %c0_3] : memref<8x8xf32, #tpu.memory_space<vmem>>, vector<8x8xf32>
    %cst = arith.constant dense<0.000000e+00> : vector<8x8xf32>
    %5 = tpu.matmul %3, %3, %cst {dimension_numbers = #tpu.dot_dimension_numbers<[1], [1], [0], [0], [0, 0, 1, 0], [], []>} : vector<8x256xf32>, vector<8x256xf32>, vector<8x8xf32> -> vector<8x8xf32>
    %6 = arith.addf %4, %5 : vector<8x8xf32>
    %c0_4 = arith.constant 0 : index
    %c0_5 = arith.constant 0 : index
    %7 = vector.load %arg3[%c0_4, %c0_5] : memref<8x8xf32, #tpu.memory_space<vmem>>, vector<8x8xf32>
    tpu.vector_store %arg3[%c0_4, %c0_5], %6 {strides = array<i32>} : memref<8x8xf32, #tpu.memory_space<vmem>>, vector<8x8xf32>,
    %c0_i32_6 = arith.constant 0 : i32
    %8 = arith.cmpi eq, %arg0, %c0_i32_6 : i32
    %9 = arith.extui %8 : i1 to i32
    %c0_i32_7 = arith.constant 0 : i32
    %10 = arith.cmpi ne, %9, %c0_i32_7 : i32
    scf.if %10 {
      %c0_8 = arith.constant 0 : index
      %c0_9 = arith.constant 0 : index
      %11 = vector.load %arg3[%c0_8, %c0_9] : memref<8x8xf32, #tpu.memory_space<vmem>>, vector<8x8xf32>
      %cst_10 = arith.constant 4.8828125E-4 : f32
      %12 = vector.broadcast %cst_10 : f32 to vector<8x8xf32>
      %13 = arith.mulf %11, %12 : vector<8x8xf32>
      %c0_11 = arith.constant 0 : index
      %c0_12 = arith.constant 0 : index
      %14 = vector.load %arg2[%c0_11, %c0_12] : memref<8x8xf32, #tpu.memory_space<vmem>>, vector<8x8xf32>
      tpu.vector_store %arg2[%c0_11, %c0_12], %13 {strides = array<i32>} : memref<8x8xf32, #tpu.memory_space<vmem>>, vector<8x8xf32>,
    } else {
    }
    return
  }
  func.func @transform_0(%arg0: i32) -> (i32, i32) {
    %c0_i32 = arith.constant 0 : i32
    %c0_i32_0 = arith.constant 0 : i32
    return %c0_i32, %arg0 : i32, i32
  }
  func.func @transform_1(%arg0: i32) -> (i32, i32) {
    %c0_i32 = arith.constant 0 : i32
    %c0_i32_0 = arith.constant 0 : i32
    %c0_i32_1 = arith.constant 0 : i32
    return %c0_i32, %c0_i32_0 : i32, i32
  }
}

</mosaic_0001>

<bundles_post_ra>
// kernel: tpu_custom_call.1
= control target key start
LH: loop header
LB: loop body
LE: loop exit
PB: predicated region body
PF: predicated region fallthrough
CT: control target
= control target key end

     0   :  { %6 = vsyncpa [#allocation4], 0  ;;  %s215_s0 = inlined_call_operand.hbm [shape: f32[8,256], index: 0, kind: input, shape index: {}]   ;;  %s216_s1 = inlined_call_operand.hbm [shape: f32[8,8], index: 1, kind: output, shape index: {}]  }
   0x1   :  { %7 = vsyncpa [#allocation5], 0  ;;  %s175_s6 = smov [#allocation3]   ;;  %s127_s10 = scalar_lea.hbm %s215_s0, 256 }
   0x2   :  { %s14_s7 = sshll.u32 %s175_s6, 4  ;;  %p128_p0 = scmp.ne.s32.totalorder %s215_s0, %s127_s10  ;;  %s15_s7 = int_to_ptr.vmem [resolvable:$true] %s14_s7 }
   0x3   :  { %p131_p1 = scmp.lt.u32.totalorder %s127_s10, %s215_s0 }
   0x5   :  { %p133_p2 = pnand %p131_p1, %p128_p0 }
   0x7   :  { %136 = shalt.err (!%p133_p2)
}
   0x8   :  { %s137_s15 = scalar_lea.vmem %s15_s7, 256  ;;  %p142_p4 = scmp.lt.s32.totalorder %s15_s7, %s15_s7 }
   0x9   :  { %p138_p3 = scmp.ne.s32.totalorder %s15_s7, %s137_s15  ;;  %p143_p5 = scmp.lt.s32.totalorder %s137_s15, %s137_s15 }
   0xb   :  { %p144_p6 = por %p143_p5, %p142_p4 }
   0xd   :  { %p145_p7 = pnand %p144_p6, %p138_p3 }
   0xf   :  { %148 = shalt.err (!%p145_p7)
}
  0x10   :  { %17 = dma.hbm_to_vmem [thread:$0]  %s215_s0, 256, %s15_s7, [#allocation4]  }
  0x11   :  { %171 = dma.done.wait [#allocation4], 256  }
  0x12   :  { %172 = vsyncadd [#allocation4], 4294967040  ;;  %vm25_vm0 = vcmask 64512   ;;  %v176_v0 = vmov 0.0   ;;  %v28_v1 = vld [vmem:[#allocation3 + $0x8] sm:$0xff]  ;;  %v27_v2 = vld [vmem:[#allocation3] sm:$0xff] }
  0x13   :  { %26 = vst.msk [vmem:[#allocation2] sm:$0xff] %vm25_vm0, %v176_v0  ;;  %30 = vmatprep.subr.mxu0 %v28_v1  ;;  %94 = vmatprep.mubr.f32.mxu0 %v28_v1  ;;  %s177_s18 = smov [#allocation6]  }
  0x14   :  { %31 = vmatpush1.xpose.msra.mxu0 %v27_v2  ;;  %s115_s0 = sshll.u32 %s177_s18, 4  ;;  %s116_s0 = int_to_ptr.vmem [resolvable:$true] %s115_s0 }
  0x15   :  { %s149_s19 = scalar_lea.vmem %s116_s0, 128  ;;  %p154_p9 = scmp.lt.s32.totalorder %s116_s0, %s116_s0 }
  0x16   :  { %p150_p8 = scmp.ne.s32.totalorder %s116_s0, %s149_s19  ;;  %p155_p10 = scmp.lt.s32.totalorder %s149_s19, %s149_s19 }
  0x17   :  { %95 = vmatmul.mubr.f32.vlgmr.msra.gmra.mrb[0].mxu0 %v27_v2 }
  0x18   :  { %p156_p11 = por %p155_p10, %p154_p9 }
  0x1a   :  { %v29_v3 = vld [vmem:[#allocation2] sm:$0xff]  ;;  %p157_p12 = pnand %p156_p11, %p150_p8 }
  0xea   :  { %v96_v4 = vpop.f32.mrb[0].mxu0 }
  0xeb   :  { %v100_v5 = vadd.f32 %v96_v4, %v29_v3  ;;  %v98_v6 = vpop.f32.mrb[1].mxu0 }
  0xed   :  { %102 = vst.msk [vmem:[#allocation2] sm:$0xff] %vm25_vm0, %v100_v5 }
  0xf4   :  { %v106_v7 = vld [vmem:[#allocation2] sm:$0xff] }
  0xf5   :  { %v107_v8 = vmul.f32 0.00048828125, %v106_v7 }
  0xf7   :  { %108 = vst.msk [vmem:[#allocation6] sm:$0xff] %vm25_vm0, %v107_v8 }
  0xf8   :  { %160 = shalt.err (!%p157_p12)
}
  0xf9   :  { %s161_s22 = scalar_lea.hbm %s216_s1, 128 }
  0xfa   :  { %p162_p13 = scmp.ne.s32.totalorder %s216_s1, %s161_s22  ;;  %p165_p0 = scmp.lt.u32.totalorder %s161_s22, %s216_s1 }
  0xfc   :  { %p167_p1 = pnand %p165_p0, %p162_p13 }
  0xfe   :  { %170 = shalt.err (!%p167_p1)
}
  0xff   :  { %118 = dma.vmem_to_hbm [thread:$0]  %s116_s0, 128, %s216_s1, [#allocation5]  }
 0x100   :  { %173 = dma.done.wait [#allocation5], 128  }
 0x101   :  { %174 = vsyncadd [#allocation5], 4294967168 }
 0x102   :  { %122 = vsyncpa [#allocation4], 1 }
 0x103   :  { %123 = vsyncpa [#allocation5], 1 }

</bundles_post_ra>
